<compile_context>
chip_gen: v6e
topology: v6e:2x2x1
jax: 0.10.0
libtpu: 0.0.40
codegen_flags: <defaults>
</compile_context>

<pallas_src>
import jax
import jax.numpy as jnp
from jax.experimental import pallas as pl
from jax.experimental.pallas import tpu as pltpu


def _round_up(x, m):
    return ((x + m - 1) // m) * m


def mlp_kernel(x_ref, w1_ref, b1_ref, w2_ref, b2_ref, w3_ref, b3_ref, o_ref):
    """One batch tile, transposed layout (features on sublanes, batch on lanes).

    x_ref : (in_features, TILE_B)   bf16
    wN    : (fan_out, fan_in)       bf16   (torch layout -> W @ x)
    bN    : (fan_out, 1)            f32
    o_ref : (out_features, TILE_B)  f32
    """
    x = x_ref[...]
    h = jnp.dot(w1_ref[...], x, preferred_element_type=jnp.float32) + b1_ref[...]
    h = jnp.maximum(h, 0.0).astype(x.dtype)
    h = jnp.dot(w2_ref[...], h, preferred_element_type=jnp.float32) + b2_ref[...]
    h = jnp.maximum(h, 0.0).astype(x.dtype)
    out = jnp.dot(w3_ref[...], h, preferred_element_type=jnp.float32) + b3_ref[...]
    o_ref[...] = out.astype(o_ref.dtype)


def mlp_forward(x, w1, b1, w2, b2, w3, b3, *, tile_b=512,
                matmul_dtype=jnp.bfloat16):
    """x: (batch, in), wN: (fan_out, fan_in), bN: (fan_out,) — torch layout."""
    batch, in_features = x.shape
    h1_dim = w1.shape[0]
    h2_dim = w2.shape[0]
    out_features = w3.shape[0]

    # Batch tile sits on the lane axis -> multiple of 128; cap at tile_b.
    tb = min(tile_b, _round_up(batch, 128))
    padded_batch = _round_up(batch, tb)
    grid = (padded_batch // tb,)

    # Transpose so batch is on lanes, zero-pad to the tile size, cast MXU
    # operands to bf16 (accumulation stays f32 inside the kernel).
    x_t = jnp.zeros((in_features, padded_batch), matmul_dtype)
    x_t = x_t.at[:, :batch].set(x.T.astype(matmul_dtype))

    w1c = w1.astype(matmul_dtype)
    w2c = w2.astype(matmul_dtype)
    w3c = w3.astype(matmul_dtype)
    b1c = b1.reshape(h1_dim, 1).astype(jnp.float32)
    b2c = b2.reshape(h2_dim, 1).astype(jnp.float32)
    b3c = b3.reshape(out_features, 1).astype(jnp.float32)

    # Weights/biases: same block every grid step -> stay resident in VMEM.
    def resident(shape):
        return pl.BlockSpec(shape, lambda i: (0, 0))

    flops = 2 * padded_batch * (in_features * h1_dim
                                + h1_dim * h2_dim
                                + h2_dim * out_features)
    bytes_accessed = (
        x_t.size * x_t.dtype.itemsize
        + sum(a.size * a.dtype.itemsize
              for a in (w1c, b1c, w2c, b2c, w3c, b3c))
        + padded_batch * out_features * 4
    )

    out_t = pl.pallas_call(
        mlp_kernel,
        out_shape=jax.ShapeDtypeStruct((out_features, padded_batch), jnp.float32),
        grid=grid,
        in_specs=[
            pl.BlockSpec((in_features, tb), lambda i: (0, i)),
            resident(w1c.shape),
            resident(b1c.shape),
            resident(w2c.shape),
            resident(b2c.shape),
            resident(w3c.shape),
            resident(b3c.shape),
        ],
        out_specs=pl.BlockSpec((out_features, tb), lambda i: (0, i)),
        compiler_params=pltpu.CompilerParams(
            dimension_semantics=("parallel",)),
        cost_estimate=pl.CostEstimate(
            flops=flops, transcendentals=0, bytes_accessed=bytes_accessed),
    )(x_t, w1c, b1c, w2c, b2c, w3c, b3c)

    # Drop batch padding and transpose back to (batch, out_features).
    return out_t[:, :batch].T


def init_linear(key, fan_in, fan_out):
    # Deterministic init mimicking torch.nn.Linear (uniform +/- 1/sqrt(fan_in)),
    # torch weight layout (fan_out, fan_in).
    kw, kb = jax.random.split(key)
    bound = 1.0 / jnp.sqrt(jnp.float32(fan_in))
    w = jax.random.uniform(kw, (fan_out, fan_in), jnp.float32, -bound, bound)
    b = jax.random.uniform(kb, (fan_out,), jnp.float32, -bound, bound)
    return w, b


if __name__ == "__main__":
    # Small shapes consistent with the module: in_features=4, h1=16, h2=16, out=3
    batch, in_features, h1, h2, out_features = 8, 4, 16, 16, 3

    key = jax.random.PRNGKey(0)
    kx, k1, k2, k3 = jax.random.split(key, 4)

    x = jax.random.normal(kx, (batch, in_features), jnp.float32)
    w1, b1 = init_linear(k1, in_features, h1)
    w2, b2 = init_linear(k2, h1, h2)
    w3, b3 = init_linear(k3, h2, out_features)

    out = mlp_forward(x, w1, b1, w2, b2, w3, b3)
    out = jax.block_until_ready(out)

    # Reference in plain JAX with the same bf16 matmul-operand precision
    # (f32 accumulate), matching the kernel's numerics.
    bf = jnp.bfloat16
    h = jnp.maximum(jnp.dot(x.astype(bf), w1.astype(bf).T,
                            preferred_element_type=jnp.float32) + b1, 0.0)
    h = jnp.maximum(jnp.dot(h.astype(bf), w2.astype(bf).T,
                            preferred_element_type=jnp.float32) + b2, 0.0)
    ref = jnp.dot(h.astype(bf), w3.astype(bf).T,
                  preferred_element_type=jnp.float32) + b3

    assert out.shape == (batch, out_features)
    assert jnp.allclose(out, ref, atol=1e-4, rtol=1e-4), "mismatch vs reference"

    print("KERNEL_OK")
</pallas_src>

<mosaic_0001>
module attributes {stable_mosaic.version = 11 : i64} {
  func.func @mlp_kernel(%arg0: i32, %arg1: memref<4x128xbf16, #tpu.memory_space<vmem>>, %arg2: memref<16x4xbf16, #tpu.memory_space<vmem>>, %arg3: memref<16x1xf32, #tpu.memory_space<vmem>>, %arg4: memref<16x16xbf16, #tpu.memory_space<vmem>>, %arg5: memref<16x1xf32, #tpu.memory_space<vmem>>, %arg6: memref<3x16xbf16, #tpu.memory_space<vmem>>, %arg7: memref<3x1xf32, #tpu.memory_space<vmem>>, %arg8: memref<3x128xf32, #tpu.memory_space<vmem>>) attributes {dimension_semantics = [#tpu.dimension_semantics<parallel>], iteration_bounds = array<i64: 1>, scalar_prefetch = 0 : i64, scratch_operands = 0 : i64, tpu.core_type = #tpu.core_type<tc>, window_params = [{transform_indices = @transform_0, window_bounds = array<i64: 4, 128>}, {pipeline_mode = #tpu.pipeline_mode<synchronous>, transform_indices = @transform_1, window_bounds = array<i64: 16, 4>}, {pipeline_mode = #tpu.pipeline_mode<synchronous>, transform_indices = @transform_2, window_bounds = array<i64: 16, 1>}, {pipeline_mode = #tpu.pipeline_mode<synchronous>, transform_indices = @transform_3, window_bounds = array<i64: 16, 16>}, {pipeline_mode = #tpu.pipeline_mode<synchronous>, transform_indices = @transform_4, window_bounds = array<i64: 16, 1>}, {pipeline_mode = #tpu.pipeline_mode<synchronous>, transform_indices = @transform_5, window_bounds = array<i64: 3, 16>}, {pipeline_mode = #tpu.pipeline_mode<synchronous>, transform_indices = @transform_6, window_bounds = array<i64: 3, 1>}, {transform_indices = @transform_7, window_bounds = array<i64: 3, 128>}]} {
    %c0 = arith.constant 0 : index
    %c0_0 = arith.constant 0 : index
    %0 = vector.load %arg1[%c0, %c0_0] : memref<4x128xbf16, #tpu.memory_space<vmem>>, vector<4x128xbf16>
    %c0_1 = arith.constant 0 : index
    %c0_2 = arith.constant 0 : index
    %1 = vector.load %arg2[%c0_1, %c0_2] : memref<16x4xbf16, #tpu.memory_space<vmem>>, vector<16x4xbf16>
    %cst = arith.constant dense<0.000000e+00> : vector<16x128xf32>
    %2 = tpu.matmul %1, %0, %cst {dimension_numbers = #tpu.dot_dimension_numbers<[1], [0], [0], [1], [0, 0, 1, 1], [], []>} : vector<16x4xbf16>, vector<4x128xbf16>, vector<16x128xf32> -> vector<16x128xf32>
    %c0_3 = arith.constant 0 : index
    %c0_4 = arith.constant 0 : index
    %3 = vector.load %arg3[%c0_3, %c0_4] : memref<16x1xf32, #tpu.memory_space<vmem>>, vector<16x1xf32>
    %4 = vector.broadcast %3 : vector<16x1xf32> to vector<16x128xf32>
    %5 = arith.addf %2, %4 : vector<16x128xf32>
    %cst_5 = arith.constant 0.000000e+00 : f32
    %6 = vector.broadcast %cst_5 : f32 to vector<16x128xf32>
    %7 = arith.maximumf %5, %6 : vector<16x128xf32>
    %8 = arith.truncf %7 : vector<16x128xf32> to vector<16x128xbf16>
    %c0_6 = arith.constant 0 : index
    %c0_7 = arith.constant 0 : index
    %9 = vector.load %arg4[%c0_6, %c0_7] : memref<16x16xbf16, #tpu.memory_space<vmem>>, vector<16x16xbf16>
    %cst_8 = arith.constant dense<0.000000e+00> : vector<16x128xf32>
    %10 = tpu.matmul %9, %8, %cst_8 {dimension_numbers = #tpu.dot_dimension_numbers<[1], [0], [0], [1], [0, 0, 1, 1], [], []>} : vector<16x16xbf16>, vector<16x128xbf16>, vector<16x128xf32> -> vector<16x128xf32>
    %c0_9 = arith.constant 0 : index
    %c0_10 = arith.constant 0 : index
    %11 = vector.load %arg5[%c0_9, %c0_10] : memref<16x1xf32, #tpu.memory_space<vmem>>, vector<16x1xf32>
    %12 = vector.broadcast %11 : vector<16x1xf32> to vector<16x128xf32>
    %13 = arith.addf %10, %12 : vector<16x128xf32>
    %cst_11 = arith.constant 0.000000e+00 : f32
    %14 = vector.broadcast %cst_11 : f32 to vector<16x128xf32>
    %15 = arith.maximumf %13, %14 : vector<16x128xf32>
    %16 = arith.truncf %15 : vector<16x128xf32> to vector<16x128xbf16>
    %c0_12 = arith.constant 0 : index
    %c0_13 = arith.constant 0 : index
    %17 = vector.load %arg6[%c0_12, %c0_13] : memref<3x16xbf16, #tpu.memory_space<vmem>>, vector<3x16xbf16>
    %cst_14 = arith.constant dense<0.000000e+00> : vector<3x128xf32>
    %18 = tpu.matmul %17, %16, %cst_14 {dimension_numbers = #tpu.dot_dimension_numbers<[1], [0], [0], [1], [0, 0, 1, 1], [], []>} : vector<3x16xbf16>, vector<16x128xbf16>, vector<3x128xf32> -> vector<3x128xf32>
    %c0_15 = arith.constant 0 : index
    %c0_16 = arith.constant 0 : index
    %19 = vector.load %arg7[%c0_15, %c0_16] : memref<3x1xf32, #tpu.memory_space<vmem>>, vector<3x1xf32>
    %20 = vector.broadcast %19 : vector<3x1xf32> to vector<3x128xf32>
    %21 = arith.addf %18, %20 : vector<3x128xf32>
    %c0_17 = arith.constant 0 : index
    %c0_18 = arith.constant 0 : index
    %22 = vector.load %arg8[%c0_17, %c0_18] : memref<3x128xf32, #tpu.memory_space<vmem>>, vector<3x128xf32>
    tpu.vector_store %arg8[%c0_17, %c0_18], %21 {strides = array<i32>} : memref<3x128xf32, #tpu.memory_space<vmem>>, vector<3x128xf32>,
    return
  }
  func.func @transform_0(%arg0: i32) -> (i32, i32) {
    %c0_i32 = arith.constant 0 : i32
    %c0_i32_0 = arith.constant 0 : i32
    return %c0_i32, %arg0 : i32, i32
  }
  func.func @transform_1(%arg0: i32) -> (i32, i32) {
    %c0_i32 = arith.constant 0 : i32
    %c0_i32_0 = arith.constant 0 : i32
    %c0_i32_1 = arith.constant 0 : i32
    return %c0_i32, %c0_i32_0 : i32, i32
  }
  func.func @transform_2(%arg0: i32) -> (i32, i32) {
    %c0_i32 = arith.constant 0 : i32
    %c0_i32_0 = arith.constant 0 : i32
    %c0_i32_1 = arith.constant 0 : i32
    return %c0_i32, %c0_i32_0 : i32, i32
  }
  func.func @transform_3(%arg0: i32) -> (i32, i32) {
    %c0_i32 = arith.constant 0 : i32
    %c0_i32_0 = arith.constant 0 : i32
    %c0_i32_1 = arith.constant 0 : i32
    return %c0_i32, %c0_i32_0 : i32, i32
  }
  func.func @transform_4(%arg0: i32) -> (i32, i32) {
    %c0_i32 = arith.constant 0 : i32
    %c0_i32_0 = arith.constant 0 : i32
    %c0_i32_1 = arith.constant 0 : i32
    return %c0_i32, %c0_i32_0 : i32, i32
  }
  func.func @transform_5(%arg0: i32) -> (i32, i32) {
    %c0_i32 = arith.constant 0 : i32
    %c0_i32_0 = arith.constant 0 : i32
    %c0_i32_1 = arith.constant 0 : i32
    return %c0_i32, %c0_i32_0 : i32, i32
  }
  func.func @transform_6(%arg0: i32) -> (i32, i32) {
    %c0_i32 = arith.constant 0 : i32
    %c0_i32_0 = arith.constant 0 : i32
    %c0_i32_1 = arith.constant 0 : i32
    return %c0_i32, %c0_i32_0 : i32, i32
  }
  func.func @transform_7(%arg0: i32) -> (i32, i32) {
    %c0_i32 = arith.constant 0 : i32
    %c0_i32_0 = arith.constant 0 : i32
    return %c0_i32, %arg0 : i32, i32
  }
}

</mosaic_0001>

<bundles_post_ra>
// kernel: tpu_custom_call.1
= control target key start
LH: loop header
LB: loop body
LE: loop exit
PB: predicated region body
PF: predicated region fallthrough
CT: control target
= control target key end

     0   :  { %vm52_vm0 = vcmask 1041408   ;;  %v291_v1 = vmov 0.0   ;;  %vm292_vm1 = vmmov 0   ;;  %vm48_vm2 = vcmask 31744   ;;  %s368_s0 = inlined_call_operand.vmem [shape: bf16[4,128], index: 0, kind: input, shape index: {}]   ;;  %s369_s1 = inlined_call_operand.vmem [shape: bf16[16,4], index: 1, kind: input, shape index: {}]   ;;  %s370_s2 = inlined_call_operand.vmem [shape: f32[16,1], index: 2, kind: input, shape index: {}]   ;;  %s371_s3 = inlined_call_operand.vmem [shape: bf16[16,16], index: 3, kind: input, shape index: {}]   ;;  %s372_s4 = inlined_call_operand.vmem [shape: f32[16,1], index: 4, kind: input, shape index: {}]   ;;  %s373_s5 = inlined_call_operand.vmem [shape: bf16[3,16], index: 5, kind: input, shape index: {}]   ;;  %s374_s6 = inlined_call_operand.vmem [shape: f32[3,1], index: 6, kind: input, shape index: {}]   ;;  %s375_s7 = inlined_call_operand.hbm [shape: f32[3,128], index: 7, kind: output, shape index: {}]  }
   0x1   :  { %v28_v0 = vld [vmem:[%s368_s0] sm:$0x3]  ;;  %243 = vmatprep.subr.bf16.mxu0 %v291_v1  ;;  %245 = vmatprep.mubr.msk.bf16.mxu0 %vm292_vm1, %v291_v1  ;;  %v293_v5 = vmov 0  }
   0x2   :  { %v54_v2 = vsel %vm52_vm0, %v28_v0, 0  ;;  %v267_v3 = vld [vmem:[%s369_s1] sm:$0xff]   ;;  %249 = vmatprep.subr.bf16.mxu1 %v291_v1  ;;  %265 = vset.pattern.permute.xlu0 %v293_v5 }
   0x3   :  { %244 = vmatpush3.bf16.msra.mxu0 %v54_v2  ;;  %v31_v4 = vld [vmem:[%s370_s2] sm:$0xff]  ;;  %251 = vmatprep.mubr.msk.bf16.mxu1 %vm292_vm1, %v291_v1 }
   0x4   :  { %12 = vsyncpa [#allocation3], 0  ;;  %35 = vperm.xlu0 %265, %v31_v4   ;;  %266 = vset.pattern.permute.xlu1 %v293_v5  ;;  %v32_v6 = vld [vmem:[%s370_s2 + $0x8] sm:$0xff]  ;;  %v168_v7 = vld [vmem:[%s374_s6] sm:$0x7]  ;;  %vm119_vm3 = vcmask 130048  }
   0x5   :  { %255 = vmatprep.subr.bf16.mxu0 %v291_v1  ;;  %v102_v8 = vld [vmem:[%s372_s4] sm:$0xff]  ;;  %v103_v9 = vld [vmem:[%s372_s4 + $0x8] sm:$0xff] }
   0x6   :  { %246 = vmatmul.mubr.msk.bf16.vlgmr.msra.gmra.mxu0 %vm48_vm2, %v267_v3  ;;  %106 = vperm.xlu1 %266, %v102_v8   ;;  %v268_v21 = vld [vmem:[%s371_s3] sm:$0xff]   ;;  %s294_s3 = smov [#allocation2]  }
   0x7   :  { %257 = vmatprep.mubr.msk.bf16.mxu0 %vm292_vm1, %v291_v1  ;;  %v167_v33 = vld [vmem:[%s373_s5] sm:$0x3]  ;;  %s224_s14 = sshll.u32 %s294_s3, 4  ;;  %s225_s14 = int_to_ptr.vmem [resolvable:$true] %s224_s14 }
   0x8   :  { %40 = vperm.xlu0 %265, %v32_v6   ;;  %s269_s15 = scalar_lea.vmem %s225_s14, 64  ;;  %p274_p1 = scmp.lt.s32.totalorder %s225_s14, %s225_s14 }
   0x9   :  { %p270_p0 = scmp.ne.s32.totalorder %s225_s14, %s269_s15  ;;  %p275_p2 = scmp.lt.s32.totalorder %s269_s15, %s269_s15 }
   0xa   :  { %111 = vperm.xlu1 %266, %v103_v9  }
   0xb   :  { %p276_p3 = por %p275_p2, %p274_p1 }
   0xc   :  { %171 = vperm.xlu0 %265, %v168_v7  }
   0xd   :  { %p277_p4 = pnand %p276_p3, %p270_p0 }
  0x7f   :  { %v36_v10 = vpop.permute.xlu0 %35 }
  0x81   :  { %v107_v22 = vpop.permute.xlu1 %106 }
  0x83   :  { %v41_v14 = vpop.permute.xlu0 %40 }
  0x85   :  { %v112_v26 = vpop.permute.xlu1 %111 }
  0x87   :  { %v172_v34 = vpop.permute.xlu0 %171 }
  0xc6   :  { %v90_v11 = vpop.f32.mrf.mxu0 }
  0xc7   :  { %v91_v13 = vadd.f32 %v90_v11, %v36_v10 }
  0xc8   :  { %v247_v12 = vpop.f32.mrf.mxu0 }
  0xc9   :  { %v97_v18 = vmax.f32 %v91_v13, 0.0 }
  0xca   :  { %v93_v15 = vpop.f32.mrf.mxu0 }
  0xcb   :  { %v94_v16 = vadd.f32 %v93_v15, %v41_v14 }
  0xcc   :  { %v248_v17 = vpop.f32.mrf.mxu0 }
  0xcd   :  { %v98_v19 = vmax.f32 %v94_v16, 0.0 }
  0xcf   :  { %v99_v20 = vpack.c.bf16 %v98_v19, %v97_v18 }
  0xd1   :  { %250 = vmatpush3.bf16.msra.mxu1 %v99_v20 }
  0xd4   :  { %252 = vmatmul.mubr.msk.bf16.vlgmr.msra.gmra.mxu1 %vm119_vm3, %v268_v21 }
 0x194   :  { %v157_v23 = vpop.f32.mrf.mxu1 }
 0x195   :  { %v158_v25 = vadd.f32 %v157_v23, %v107_v22 }
 0x196   :  { %v253_v24 = vpop.f32.mrf.mxu1 }
 0x197   :  { %v164_v30 = vmax.f32 %v158_v25, 0.0 }
 0x198   :  { %v160_v27 = vpop.f32.mrf.mxu1 }
 0x199   :  { %v161_v28 = vadd.f32 %v160_v27, %v112_v26 }
 0x19a   :  { %v254_v29 = vpop.f32.mrf.mxu1 }
 0x19b   :  { %v165_v31 = vmax.f32 %v161_v28, 0.0 }
 0x19d   :  { %v166_v32 = vpack.c.bf16 %v165_v31, %v164_v30 }
 0x19f   :  { %256 = vmatpush3.bf16.msra.mxu0 %v166_v32 }
 0x1a2   :  { %258 = vmatmul.mubr.msk.bf16.vlgmr.msra.gmra.mxu0 %vm119_vm3, %v167_v33 }
 0x262   :  { %v211_v35 = vpop.f32.mrf.mxu0 }
 0x263   :  { %v212_v36 = vadd.f32 %v211_v35, %v172_v34 }
 0x264   :  { %v259_v37 = vpop.f32.mrf.mxu0 }
 0x265   :  { %217 = vst [vmem:[#allocation2] sm:$0x7] %v212_v36 }
 0x266   :  { %v214_v38 = vpop.f32.mrf.mxu0 }
 0x267   :  { %280 = shalt.err (!%p277_p4)
}
 0x268   :  { %227 = dma.vmem_to_hbm [thread:$0]  %s225_s14, 64, %s375_s7, [#allocation3]   ;;  %v260_v39 = vpop.f32.mrf.mxu0 }
 0x269   :  { %289 = dma.done.wait [#allocation3], 64  }
 0x26a   :  { %290 = vsyncadd [#allocation3], 4294967232 }
 0x26b   :  { %231 = vsyncpa [#allocation3], 1 }

</bundles_post_ra>
